<compile_context>
chip_gen: v6e
topology: v6e:2x2x1
jax: 0.10.0
libtpu: 0.0.40
codegen_flags: <defaults>
</compile_context>

<pallas_src>
import jax
import jax.numpy as jnp
from jax.experimental import pallas as pl
from jax.experimental.pallas import tpu as pltpu


def _band_matrix(c, size):
    """(C, C) 0/1 matrix W with W[i, j] = 1 iff j in [i - size//2, i + (size-1)//2].

    acc = W @ sq reproduces PyTorch F.local_response_norm's zero-padded channel
    window sum exactly (size//2 zeros before, (size-1)//2 after)."""
    ci = jax.lax.broadcasted_iota(jnp.int32, (c, c), 0)
    cj = jax.lax.broadcasted_iota(jnp.int32, (c, c), 1)
    d = cj - ci
    band = jnp.logical_and(d >= -(size // 2), d <= (size - 1) // 2)
    return jnp.where(band, jnp.float32(1.0), jnp.float32(0.0))


def _lrn2_kernel(x_ref, o_ref):
    x = x_ref[...].astype(jnp.float32)                    # (C, T) f32 compute path
    c = x.shape[0]
    w3 = _band_matrix(c, 3)                                # tiny O(C^2) VPU work
    w5 = _band_matrix(c, 5)

    # ---- ln_0: LocalResponseNorm(size=3, alpha=1e-4, beta=0.75, k=1.0) ----
    sq = x * x
    acc0 = jnp.dot(w3, sq, preferred_element_type=jnp.float32)   # MXU window sum
    d0 = 1.0 + jnp.float32(1e-4 / 3.0) * acc0
    inv0 = jnp.exp(jnp.float32(-0.75) * jnp.log(d0))       # d0 ** -0.75 (2 EUP ops)
    y = x * inv0

    # ---- ln_1: LocalResponseNorm(size=5, alpha=1e-3, beta=0.8, k=0.9) ----
    sq1 = sq * (inv0 * inv0)                               # y*y reuses x*x (values only)
    acc1 = jnp.dot(w5, sq1, preferred_element_type=jnp.float32)  # MXU window sum
    d1 = 0.9 + jnp.float32(1e-3 / 5.0) * acc1
    inv1 = jnp.exp(jnp.float32(-0.8) * jnp.log(d1))        # d1 ** -0.8 (2 EUP ops)

    o_ref[...] = (y * inv1).astype(o_ref.dtype)            # single store stream


def _pick_tile(hw, c, itemsize, n):
    """Lane tile (multiple of 128) targeting ~1 MiB of in+out HBM traffic per grid
    step, capped so double-buffered in/out blocks plus f32 temps stay ~<10 MiB."""
    target_step_bytes = 1 << 20
    t = target_step_bytes // max(2 * c * itemsize, 1)
    vmem_budget = 10 * (1 << 20)                  # safe under v5e 16 MiB scoped default
    per_lane_bytes = c * (4 * itemsize + 6 * 4)   # 2x2 buffered blocks + ~6 f32 temps
    t = min(t, vmem_budget // max(per_lane_bytes, 1))
    t = max(128, (t // 128) * 128)
    hw128 = -(-hw // 128) * 128
    t = min(t, hw128)                             # never larger than the padded row
    if n == 1 and t >= hw128 and t >= 256:        # v7x: keep both TensorCores busy
        t = max(128, (t // 256) * 128)
    return t


def local_response_norm_x2(x):
    n, c, h, w = x.shape
    hw = h * w
    itemsize = jnp.dtype(x.dtype).itemsize
    tile = _pick_tile(hw, c, itemsize, n)
    hw_pad = -(-hw // tile) * tile

    x2 = x.reshape(n, c, hw)                      # lane-dense layout for the kernel
    if hw_pad != hw:
        x2 = jnp.pad(x2, ((0, 0), (0, 0), (0, hw_pad - hw)))

    out = pl.pallas_call(
        _lrn2_kernel,
        out_shape=jax.ShapeDtypeStruct((n, c, hw_pad), x.dtype),
        grid_spec=pltpu.PrefetchScalarGridSpec(
            num_scalar_prefetch=0,
            grid=(n, hw_pad // tile),
            in_specs=[pl.BlockSpec((None, c, tile), lambda i, j: (i, 0, j))],
            out_specs=pl.BlockSpec((None, c, tile), lambda i, j: (i, 0, j)),
        ),
        compiler_params=pltpu.CompilerParams(
            dimension_semantics=("parallel", "parallel")),
    )(x2)

    if hw_pad != hw:
        out = out[:, :, :hw]
    return out.reshape(n, c, h, w)


def _lrn_ref(x, size, alpha, beta, k):
    # pure-JAX reference (PyTorch F.local_response_norm semantics)
    sq = x * x
    padded = jnp.pad(sq, ((0, 0), (size // 2, (size - 1) // 2), (0, 0), (0, 0)))
    c = x.shape[1]
    acc = sum(padded[:, i:i + c] for i in range(size))
    return x / jnp.power(k + (alpha / size) * acc, beta)


if __name__ == "__main__":
    key = jax.random.PRNGKey(0)
    x = jax.random.uniform(key, (2, 4, 16, 16), dtype=jnp.float32)

    out = jax.block_until_ready(local_response_norm_x2(x))

    ref = _lrn_ref(_lrn_ref(x, 3, 1e-4, 0.75, 1.0), 5, 0.001, 0.8, 0.9)
    assert out.shape == x.shape and out.dtype == x.dtype
    err = float(jnp.max(jnp.abs(out - ref)))
    assert jnp.allclose(out, ref, atol=1e-5, rtol=1e-5), err

    print("KERNEL_OK")
</pallas_src>

<mosaic_0001>
module attributes {stable_mosaic.version = 11 : i64} {
  func.func @_lrn2_kernel(%arg0: i32, %arg1: i32, %arg2: memref<1x4x256xf32, #tpu.memory_space<vmem>>, %arg3: memref<1x4x256xf32, #tpu.memory_space<vmem>>) attributes {dimension_semantics = [#tpu.dimension_semantics<parallel>, #tpu.dimension_semantics<parallel>], iteration_bounds = array<i64: 2, 1>, scalar_prefetch = 0 : i64, scratch_operands = 0 : i64, tpu.core_type = #tpu.core_type<tc>, window_params = [{transform_indices = @transform_0, window_bounds = array<i64: 1, 4, 256>}, {transform_indices = @transform_1, window_bounds = array<i64: 1, 4, 256>}]} {
    %c0 = arith.constant 0 : index
    %c0_0 = arith.constant 0 : index
    %c0_1 = arith.constant 0 : index
    %0 = vector.load %arg2[%c0, %c0_0, %c0_1] : memref<1x4x256xf32, #tpu.memory_space<vmem>>, vector<1x4x256xf32>
    %1 = vector.shape_cast %0 : vector<1x4x256xf32> to vector<4x256xf32>
    %2 = tpu.iota {dimensions = array<i32: 0>} : vector<4x4xi32>
    %3 = tpu.iota {dimensions = array<i32: 1>} : vector<4x4xi32>
    %4 = arith.subi %3, %2 : vector<4x4xi32>
    %c-1_i32 = arith.constant -1 : i32
    %5 = vector.broadcast %c-1_i32 : i32 to vector<4x4xi32>
    %6 = arith.cmpi sge, %4, %5 : vector<4x4xi32>
    %c1_i32 = arith.constant 1 : i32
    %7 = vector.broadcast %c1_i32 : i32 to vector<4x4xi32>
    %8 = arith.cmpi sle, %4, %7 : vector<4x4xi32>
    %9 = arith.andi %6, %8 : vector<4x4xi1>
    %cst = arith.constant 1.000000e+00 : f32
    %cst_2 = arith.constant 0.000000e+00 : f32
    %10 = vector.broadcast %cst : f32 to vector<4x4xf32>
    %11 = vector.broadcast %cst_2 : f32 to vector<4x4xf32>
    %12 = arith.select %9, %10, %11 : vector<4x4xi1>, vector<4x4xf32>
    %13 = tpu.iota {dimensions = array<i32: 0>} : vector<4x4xi32>
    %14 = tpu.iota {dimensions = array<i32: 1>} : vector<4x4xi32>
    %15 = arith.subi %14, %13 : vector<4x4xi32>
    %c-2_i32 = arith.constant -2 : i32
    %16 = vector.broadcast %c-2_i32 : i32 to vector<4x4xi32>
    %17 = arith.cmpi sge, %15, %16 : vector<4x4xi32>
    %c2_i32 = arith.constant 2 : i32
    %18 = vector.broadcast %c2_i32 : i32 to vector<4x4xi32>
    %19 = arith.cmpi sle, %15, %18 : vector<4x4xi32>
    %20 = arith.andi %17, %19 : vector<4x4xi1>
    %cst_3 = arith.constant 1.000000e+00 : f32
    %cst_4 = arith.constant 0.000000e+00 : f32
    %21 = vector.broadcast %cst_3 : f32 to vector<4x4xf32>
    %22 = vector.broadcast %cst_4 : f32 to vector<4x4xf32>
    %23 = arith.select %20, %21, %22 : vector<4x4xi1>, vector<4x4xf32>
    %24 = arith.mulf %1, %1 : vector<4x256xf32>
    %cst_5 = arith.constant dense<0.000000e+00> : vector<4x256xf32>
    %25 = tpu.matmul %12, %24, %cst_5 {dimension_numbers = #tpu.dot_dimension_numbers<[1], [0], [0], [1], [0, 0, 1, 1], [], []>} : vector<4x4xf32>, vector<4x256xf32>, vector<4x256xf32> -> vector<4x256xf32>
    %cst_6 = arith.constant 3.33333337E-5 : f32
    %26 = vector.broadcast %cst_6 : f32 to vector<4x256xf32>
    %27 = arith.mulf %26, %25 : vector<4x256xf32>
    %cst_7 = arith.constant 1.000000e+00 : f32
    %28 = vector.broadcast %cst_7 : f32 to vector<4x256xf32>
    %29 = arith.addf %28, %27 : vector<4x256xf32>
    %30 = math.log %29 : vector<4x256xf32>
    %cst_8 = arith.constant -7.500000e-01 : f32
    %31 = vector.broadcast %cst_8 : f32 to vector<4x256xf32>
    %32 = arith.mulf %31, %30 : vector<4x256xf32>
    %33 = math.exp %32 : vector<4x256xf32>
    %34 = arith.mulf %1, %33 : vector<4x256xf32>
    %35 = arith.mulf %33, %33 : vector<4x256xf32>
    %36 = arith.mulf %24, %35 : vector<4x256xf32>
    %cst_9 = arith.constant dense<0.000000e+00> : vector<4x256xf32>
    %37 = tpu.matmul %23, %36, %cst_9 {dimension_numbers = #tpu.dot_dimension_numbers<[1], [0], [0], [1], [0, 0, 1, 1], [], []>} : vector<4x4xf32>, vector<4x256xf32>, vector<4x256xf32> -> vector<4x256xf32>
    %cst_10 = arith.constant 2.000000e-04 : f32
    %38 = vector.broadcast %cst_10 : f32 to vector<4x256xf32>
    %39 = arith.mulf %38, %37 : vector<4x256xf32>
    %cst_11 = arith.constant 0.899999976 : f32
    %40 = vector.broadcast %cst_11 : f32 to vector<4x256xf32>
    %41 = arith.addf %40, %39 : vector<4x256xf32>
    %42 = math.log %41 : vector<4x256xf32>
    %cst_12 = arith.constant -8.000000e-01 : f32
    %43 = vector.broadcast %cst_12 : f32 to vector<4x256xf32>
    %44 = arith.mulf %43, %42 : vector<4x256xf32>
    %45 = math.exp %44 : vector<4x256xf32>
    %46 = arith.mulf %34, %45 : vector<4x256xf32>
    %c0_13 = arith.constant 0 : index
    %c0_14 = arith.constant 0 : index
    %c0_15 = arith.constant 0 : index
    %47 = vector.load %arg3[%c0_13, %c0_14, %c0_15] : memref<1x4x256xf32, #tpu.memory_space<vmem>>, vector<1x4x256xf32>
    %48 = vector.shape_cast %47 : vector<1x4x256xf32> to vector<4x256xf32>
    %49 = vector.shape_cast %46 : vector<4x256xf32> to vector<1x4x256xf32>
    tpu.vector_store %arg3[%c0_13, %c0_14, %c0_15], %49 {strides = array<i32>} : memref<1x4x256xf32, #tpu.memory_space<vmem>>, vector<1x4x256xf32>,
    return
  }
  func.func @transform_0(%arg0: i32, %arg1: i32) -> (i32, i32, i32) {
    %c0_i32 = arith.constant 0 : i32
    %c0_i32_0 = arith.constant 0 : i32
    return %arg0, %c0_i32, %arg1 : i32, i32, i32
  }
  func.func @transform_1(%arg0: i32, %arg1: i32) -> (i32, i32, i32) {
    %c0_i32 = arith.constant 0 : i32
    %c0_i32_0 = arith.constant 0 : i32
    return %arg0, %c0_i32, %arg1 : i32, i32, i32
  }
}

</mosaic_0001>

<bundles_post_ra>
// kernel: tpu_custom_call.1
= control target key start
LH: loop header
LB: loop body
LE: loop exit
PB: predicated region body
PF: predicated region fallthrough
CT: control target
= control target key end

     0   :  { %6 = vsyncpa [#allocation3], 0  ;;  %s851_s0 = inlined_call_operand.hbm [shape: f32[2,4,256], index: 0, kind: input, shape index: {}]   ;;  %s852_s1 = inlined_call_operand.hbm [shape: f32[2,4,256], index: 1, kind: output, shape index: {}]  }
   0x1   :  { %8 = vsyncpa [#allocation3 + $0x1], 0 }
   0x2   :  { %9 = vsyncpa [#allocation4], 0 }
   0x3   :  { %11 = vsyncpa [#allocation4 + $0x1], 0  ;;  %s702_s6 = smov 0   ;;  %s704_s7 = smov 0  }
   0x4   :  { %s706_s8 = smov 0   ;;  %s708_s9 = smov 0  }
   0x5   :  { %s710_s10 = smov 0   ;;  %s712_s11 = smov 0  }
   0x6 LB: > { %s477_s12 = sadd.s32 4294967295, %s687_s11   ;;  %s478_s13 = sadd.s32 4294967294, %s687_s11   ;;  %s687_s11 = sphi %s712_s11, %s17_s11   ;;  %s683_s10 = sphi %s710_s10, %s864_s10   ;;  %s679_s9 = sphi %s708_s9, %s863_s9   ;;  %s675_s8 = sphi %s706_s8, %s862_s8   ;;  %s671_s7 = sphi %s704_s7, %s861_s7   ;;  %s667_s6 = sphi %s702_s6, %s860_s6  }
   0x7   : > { %s29_s14 = sadd.s32 1, %s683_s10  ;;  %s38_s15 = sadd.s32 1, %s675_s8 }
   0x8   : > { %p31_p0 = scmp.ge.s32.totalorder %s29_s14, 2  ;;  %p45_p1 = scmp.ne.s32.totalorder %s675_s8, %s671_s7 }
   0x9   : > { %p46_p2 = scmp.eq.s32.totalorder %s687_s11, 0  ;;  %p51_p3 = scmp.ne.s32.totalorder %s671_s7, %s667_s6 }
   0xa   : > { %s866_s14 = smov (%p31_p0, %s29_s14), 0  ;;  %p52_p5 = scmp.eq.s32.totalorder %s477_s12, 0 }
   0xb   : > { %p743_p4 = por %p46_p2, %p45_p1  ;;  %s33_s17 = ssub.s32 %s683_s10, %s866_s14 }
   0xc   : > { %p77_p6 = scmp.eq.s32.totalorder %s477_s12, 1  ;;  %p36_p7 = scmp.eq.s32.totalorder %s33_s17, 0 }
   0xd   : > { %p749_p8 = por %p52_p5, %p51_p3  ;;  %p83_p10 = scmp.eq.s32.totalorder %s478_s13, 1 }
   0xe   : > { %p753_p9 = por %p77_p6, %p45_p1  ;;  %p512_p13 = scmp.lt.s32.totalorder %s687_s11, 2 }
   0xf   : > { %s758_s20 = scalar_select %p36_p7, %s675_s8, %s38_s15  }
  0x10   : > { %p760_p11 = por %p83_p10, %p51_p3  ;;  %s103_s22 = sand.u32 1, %s675_s8  }
  0x11   : > { %s481_s23 = sshll.u32 %s103_s22, 3  ;;  %s498_s24 = sshll.u32 %s683_s10, 7 }
  0x12   : > { %s856_s21 = scalar_select %p760_p11, 1, 0 }
  0x13   : > { %s115_s27 = scalar_lea.hbm %s851_s0, %s498_s24  ;;  %s107_s28 = scalar_lea.vmem [#allocation2], %s481_s23 }
  0x14   : > { %s117_s29 = sshll.u32 %s107_s28, 4  ;;  %p773_p0 = pnand %p512_p13, %p743_p4  ;;  %s118_s29 = int_to_ptr.vmem [resolvable:$true] %s117_s29 }
  0x15   : > { %p484_p1 = scmp.ge.s32.totalorder %s687_s11, 1  ;;  %p122_p2 = scmp.lt.s32.totalorder %s687_s11, 3 }
  0x16   : > { %s104_s2 = scalar_lea.sflag [#allocation3], %s103_s22  ;;  %p581_p3 = pneg %p773_p0 }
  0x17   : > { %s592_s3 = scalar_lea.vmem %s118_s29, 128  ;;  %s689_s4 = smov [#allocation2]  }
  0x18   : > { %p593_p5 = scmp.ne.s32.totalorder %s118_s29, %s592_s3  ;;  %s597_s5 = sshll.u32 %s689_s4, 4  ;;  %s598_s5 = int_to_ptr.vmem [resolvable:$false] %s597_s5 }
  0x19   : > { %s599_s12 = scalar_lea.vmem %s598_s5, 256  ;;  %p600_p10 = scmp.lt.s32.totalorder %s118_s29, %s598_s5 }
  0x1a   : > { %p595_p6 = pnand %p593_p5, %p581_p3  ;;  %p601_p12 = scmp.lt.s32.totalorder %s599_s12, %s592_s3 }
  0x1c   : > { %p596_p7 = pneg %p595_p6  ;;  %p602_p4 = por %p601_p12, %p600_p10 }
  0x1e   : > { %p603_p13 = pnand %p602_p4, %p596_p7 }
  0x20   : > { %606 = shalt.err (!%p603_p13)
}
  0x21   : > { %507 = dma.hbm_to_vmem [thread:$0]  (!%p773_p0), %s115_s27, 128, %s118_s29, %s104_s2  }
  0x22   : > { %p123_p11 = pnand %p484_p1, %p122_p2 }
  0x23   : > { %s788_s13 = sand.u32 (!%p123_p11), 1, %s671_s7  }
  0x24   : > { %126 = sbr.rel (%p123_p11) target bundleno = 544 (0x220), region = 24  ;;  %s485_s15 = sshll.u32 (!%p123_p11), %s788_s13, 3 }
  0x25   : > { %s129_s16 = scalar_lea.sflag (!%p123_p11), [#allocation3], %s788_s13  ;;  %s132_s17 = scalar_lea.vmem (!%p123_p11), [#allocation2], %s485_s15 }
  0x29   : > { %658 = dma.done.wait (%p749_p8), %s129_s16, 128  }
  0x2a   : > { %660 = vsyncadd (%p749_p8), %s129_s16, 4294967168  ;;  %v154_v0 = vlaneseq  ;;  %v690_v1 = vmov 0.0   ;;  %v798_v5 = vld [vmem:[%s132_s17] sm:$0xff]  ;;  %vm174_vm3 = vcmask 1043456   ;;  %vm170_vm4 = vcmask 31744   ;;  %s499_s18 = sshll.u32 %s679_s9, 7 }
  0x2b   : > { %243 = vmatprep.mubr.f32.mxu0 %v690_v1  ;;  %349 = vmatprep.mubr.f32.mxu1 %v690_v1  ;;  %v167_v6 = vmul.f32 %v798_v5, %v798_v5  ;;  %s150_s22 = scalar_lea.vmem [#allocation5], %s485_s15  ;;  %s391_s26 = scalar_lea.hbm %s852_s1, %s499_s18 }
  0x2c   : > { %v155_v2 = vshrl.u32 %v154_v0, 7  ;;  %v157_v3 = vand.u32 127, %v154_v0  ;;  %s393_s23 = sshll.u32 %s150_s22, 4  ;;  %s377_s27 = scalar_lea.sflag [#allocation4], %s788_s13  ;;  %s394_s23 = int_to_ptr.vmem [resolvable:$true] %s393_s23 }
  0x2d   : > { %v169_v7 = vcombine.high %v167_v6, %v167_v6  ;;  %s607_s28 = scalar_lea.vmem %s394_s23, 128  ;;  %s691_s9 = smov [#allocation5]  }
  0x2e   : > { %v158_v4 = vsub.s32 %v157_v3, %v155_v2  ;;  %p608_p8 = scmp.ne.s32.totalorder %s394_s23, %s607_s28  ;;  %s611_s29 = sshll.u32 %s691_s9, 4  ;;  %s612_s29 = int_to_ptr.vmem [resolvable:$false] %s611_s29 }
  0x2f   : > { %487 = vmatprep.subr.msk.mxu0 %vm174_vm3, %v169_v7  ;;  %s613_s30 = scalar_lea.vmem %s612_s29, 256  ;;  %p614_p0 = scmp.lt.s32.totalorder %s394_s23, %s612_s29 }
  0x30   : > { %vm159_vm0 = vcmp.ge.s32.totalorder %v158_v4, 4294967295  ;;  %vm160_vm1 = vcmp.le.s32.totalorder %v158_v4, 1  ;;  %488 = vmatpush1.msk.msra.mxu0 %vm174_vm3, %v167_v6  ;;  %vm163_vm5 = vcmp.ge.s32.totalorder %v158_v4, 4294967294  ;;  %vm164_vm6 = vcmp.le.s32.totalorder %v158_v4, 2  ;;  %p609_p11 = pnand %p608_p8, %p753_p9  ;;  %p615_p1 = scmp.lt.s32.totalorder %s613_s30, %s607_s28 }
  0x31   : > { %vm161_vm2 = vmand %vm159_vm0, %vm160_vm1 }
  0x32   : > { %v162_v8 = vsel %vm161_vm2, 1.0, %v690_v1  ;;  %vm165_vm7 = vmand %vm163_vm5, %vm164_vm6  ;;  %p610_p12 = pneg %p609_p11  ;;  %p616_p2 = por %p615_p1, %p614_p0 }
  0x33   : > { %489 = vmatmul.mubr.msk.f32.vlgmr.msra.gmra.mxu0 %vm170_vm4, %v162_v8  ;;  %v166_v31 = vsel %vm165_vm7, 1.0, %v690_v1 }
  0x34   : > { %p617_p3 = pnand %p616_p2, %p610_p12 }
  0xf3   : > { %v245_v9 = vpop.f32.mrf.mxu0 }
  0xf4   : > { %v250_v10 = vmul.f32 3.3333334e-05, %v245_v9 }
  0xf5   : > { %v247_v11 = vpop.f32.mrf.mxu0 }
  0xf6   : > { %v252_v12 = vadd.f32 1.0, %v250_v10  ;;  %v251_v13 = vmul.f32 3.3333334e-05, %v247_v11 }
  0xf8   : > { %563 = vlog2.f32 %v252_v12  ;;  %v253_v14 = vadd.f32 1.0, %v251_v13 }
  0xfa   : > { %565 = vlog2.f32 %v253_v14 }
 0x105   : > { %v564_v15 = vpop.eup %563 }
 0x106   : > { %v255_v16 = vmul.f32 0.6931472, %v564_v15 }
 0x107   : > { %v566_v17 = vpop.eup %565 }
 0x108   : > { %v258_v18 = vmul.f32 -0.75, %v255_v16  ;;  %v257_v19 = vmul.f32 0.6931472, %v566_v17 }
 0x10a   : > { %v260_v20 = vmul.f32 1.442695, %v258_v18  ;;  %v259_v21 = vmul.f32 -0.75, %v257_v19 }
 0x10c   : > { %567 = vpow2.f32 %v260_v20  ;;  %v262_v22 = vmul.f32 1.442695, %v259_v21 }
 0x10e   : > { %569 = vpow2.f32 %v262_v22 }
 0x119   : > { %v568_v23 = vpop.eup %567 }
 0x11a   : > { %v269_v25 = vmul.f32 %v568_v23, %v568_v23 }
 0x11b   : > { %v570_v24 = vpop.eup %569 }
 0x11c   : > { %v270_v26 = vmul.f32 %v570_v24, %v570_v24  ;;  %v266_v27 = vcombine.low %v568_v23, %v570_v24 }
 0x11e   : > { %v273_v28 = vcombine.low %v269_v25, %v270_v26  ;;  %v268_v48 = vmul.f32 %v266_v27, %v798_v5 }
 0x120   : > { %v275_v29 = vmul.f32 %v273_v28, %v167_v6 }
 0x122   : > { %v277_v30 = vcombine.high %v275_v29, %v275_v29 }
 0x124   : > { %490 = vmatprep.subr.msk.mxu1 %vm174_vm3, %v277_v30 }
 0x125   : > { %491 = vmatpush1.msk.msra.mxu1 %vm174_vm3, %v275_v29 }
 0x126   : > { %492 = vmatmul.mubr.msk.f32.vlgmr.msra.gmra.mxu1 %vm170_vm4, %v166_v31 }
 0x1e6   : > { %v351_v32 = vpop.f32.mrf.mxu1 }
 0x1e7   : > { %v356_v33 = vmul.f32 0.0002, %v351_v32 }
 0x1e8   : > { %v353_v34 = vpop.f32.mrf.mxu1 }
 0x1e9   : > { %v358_v35 = vadd.f32 0.9, %v356_v33  ;;  %v357_v36 = vmul.f32 0.0002, %v353_v34 }
 0x1eb   : > { %571 = vlog2.f32 %v358_v35  ;;  %v359_v37 = vadd.f32 0.9, %v357_v36 }
 0x1ed   : > { %573 = vlog2.f32 %v359_v37 }
 0x1f8   : > { %v572_v38 = vpop.eup %571 }
 0x1f9   : > { %v361_v39 = vmul.f32 0.6931472, %v572_v38 }
 0x1fa   : > { %v574_v40 = vpop.eup %573 }
 0x1fb   : > { %v364_v41 = vmul.f32 -0.8, %v361_v39  ;;  %v363_v42 = vmul.f32 0.6931472, %v574_v40 }
 0x1fd   : > { %v366_v43 = vmul.f32 1.442695, %v364_v41  ;;  %v365_v44 = vmul.f32 -0.8, %v363_v42 }
 0x1ff   : > { %v368_v45 = vmul.f32 1.442695, %v365_v44  ;;  %575 = vpow2.f32 %v366_v43 }
 0x201   : > { %577 = vpow2.f32 %v368_v45 }
 0x20c   : > { %v576_v46 = vpop.eup %575 }
 0x20e   : > { %v578_v47 = vpop.eup %577 }
 0x20f   : > { %v372_v49 = vcombine.low %v576_v46, %v578_v47 }
 0x211   : > { %v374_v50 = vmul.f32 %v372_v49, %v268_v48 }
 0x213   : > { %375 = vst [vmem:[%s150_s22] sm:$0xff] %v374_v50 }
 0x214   : > { %620 = shalt.err (!%p617_p3)
}
 0x215   : > { %s621_s2 = scalar_lea.hbm %s391_s26, 128  ;;  %s625_s5 = scalar_lea.hbm %s852_s1, 256 }
 0x216   : > { %p622_p5 = scmp.ne.s32.totalorder %s391_s26, %s621_s2  ;;  %p626_p10 = scmp.lt.s32.totalorder %s391_s26, %s852_s1 }
 0x217   : > { %p627_p4 = scmp.lt.s32.totalorder %s625_s5, %s621_s2 }
 0x218   : > { %p623_p6 = pnand %p622_p5, %p753_p9 }
 0x219   : > { %p628_p13 = por %p627_p4, %p626_p10 }
 0x21a   : > { %p624_p7 = pneg %p623_p6 }
 0x21c   : > { %p629_p8 = pnand %p628_p13, %p624_p7 }
 0x21e   : > { %632 = shalt.err (!%p629_p8)
}
 0x21f   : > { %502 = dma.vmem_to_hbm [thread:$0]  (%p753_p9), %s394_s23, 128, %s391_s26, %s377_s27  }
 0x220 PF: > { %s405_s15 = sand.u32 1, %s667_s6   ;;  %p858_p11 = scmp.ne.s32.totalorder %s856_s21, 0 }
 0x221   : > { %p859_p12 = scmp.ge.s32.totalorder %s687_s11, 2  ;;  %s406_s16 = scalar_lea.sflag [#allocation4], %s405_s15 }
 0x223   : > { %p509_p0 = pnand %p859_p12, %p858_p11 }
 0x225   : > { %p510_p1 = pneg %p509_p0 }
 0x227   : > { %662 = dma.done.wait (%p510_p1), %s406_s16, 128  }
 0x228   : > { %664 = vsyncadd (%p510_p1), %s406_s16, 4294967168  ;;  %s17_s11 = sadd.s32 1, %s687_s11   ;;  %s860_s6 = smov %s671_s7 }
 0x229   : > { %p14_p2 = scmp.ge.s32.totalorder %s17_s11, 4   ;;  %s861_s7 = smov %s675_s8 }
 0x22a   : > { %s862_s8 = smov %s758_s20  ;;  %s863_s9 = smov %s683_s10 }
 0x22b   : > { %s864_s10 = smov %s866_s14  ;;  %16 = sbr.rel (!%p14_p2) target bundleno = 6 (0x6), region = 69 }
 0x230   :  { %411 = vsyncpa [#allocation3], 1 }
 0x231   :  { %413 = vsyncpa [#allocation3 + $0x1], 1 }
 0x232   :  { %414 = vsyncpa [#allocation4], 1 }
 0x233   :  { %416 = vsyncpa [#allocation4 + $0x1], 1 }

</bundles_post_ra>
